<compile_context>
chip_gen: v6e
topology: v6e:2x2x1
jax: 0.10.0
libtpu: 0.0.40
codegen_flags: <defaults>
</compile_context>

<pallas_src>
import functools
import math

import jax
import jax.numpy as jnp
from jax.experimental import pallas as pl
from jax.experimental.pallas import tpu as pltpu


def _round_up(x: int, m: int) -> int:
    return (x + m - 1) // m * m


def _cdiv(a: int, b: int) -> int:
    return (a + b - 1) // b


def _vmem_usable_bytes() -> int:
    """Generation-aware scoped-VMEM budget (fallback is v7x-safe 64 MiB/TC)."""
    try:
        cap = int(pltpu.get_tpu_info().vmem_capacity_bytes)
    except Exception:
        cap = 64 << 20
    # Leave headroom for compiler-internal scratch / semaphores; cap for 128-MiB parts.
    return int(min(96 << 20, max(32 << 20, cap - (16 << 20))))


def _make_kernel(inv_n: float, n_valid_rows: int, ragged: bool):
    def kernel(x_ref, w_ref, b_ref, o_ref, acc_ref):
        # x_ref: (TB, TN, D_eff) native dtype; w_ref: (D_eff, Cp); b_ref: (1, Cp)
        # o_ref: (TB, Cp); acc_ref: (TB, D_eff) f32, resident across the token axis.
        k = pl.program_id(1)

        @pl.when(k == 0)
        def _():
            acc_ref[...] = jnp.zeros_like(acc_ref)

        xb = x_ref[...]
        if ragged:
            tn = xb.shape[1]
            rows_left = n_valid_rows - k * tn                      # >= 1 always
            row_ids = jax.lax.broadcasted_iota(jnp.int32, xb.shape, 1)
            # select (not multiply): OOB garbage may be NaN/inf.
            xb = jnp.where(row_ids < rows_left, xb, jnp.zeros_like(xb))

        # Accumulate partial token sums in f32 without materializing an f32
        # copy of the whole (TB, TN, D_eff) block.
        acc_ref[...] += jnp.sum(xb, axis=1, dtype=jnp.float32)

        @pl.when(k == pl.num_programs(1) - 1)
        def _():
            pooled = (acc_ref[...] * inv_n).astype(w_ref.dtype)    # (TB, D_eff)
            logits = jnp.dot(pooled, w_ref[...],
                             preferred_element_type=jnp.float32)   # (TB, Cp) f32
            o_ref[...] = (logits + b_ref[...].astype(jnp.float32)).astype(o_ref.dtype)

    return kernel


@functools.partial(jax.jit, static_argnames=("out_dtype",))
def averaging_pooling_head(x, w_t, bias, out_dtype=None):
    """x: (B, N, D); w_t: (D, C) (transposed nn.Linear weight); bias: (1, C)."""
    B, N, D = x.shape
    C = w_t.shape[1]
    out_dtype = x.dtype if out_dtype is None else out_dtype

    itemsize = jnp.dtype(x.dtype).itemsize
    w_itemsize = jnp.dtype(w_t.dtype).itemsize
    out_itemsize = jnp.dtype(out_dtype).itemsize

    # ---- Lane folding for narrow D: pack g tokens into the lane axis (free,
    #      contiguous reshape; no HBM re-materialization). The classifier weight
    #      is stacked g times so each folded segment hits the same W.
    g = 1
    if D < 128:
        gl = 128 // math.gcd(D, 128)        # smallest g with g*D a multiple of 128
        if gl > 1 and N % gl == 0:
            g = gl
    if g > 1:
        x = x.reshape(B, N // g, g * D)
        w_t = jnp.tile(w_t, (g, 1))         # (g*D, C)
    N_eff, D_eff = N // g, D * g
    lane_D = _round_up(D_eff, 128)          # true lane-padded footprint of x rows

    # ---- Pad the (tiny) classifier weight / bias to a lane-dense class axis.
    Cp = _round_up(max(C, 1), 128)
    if Cp != C:
        w_t = jnp.pad(w_t, ((0, 0), (0, Cp - C)))
        bias = jnp.pad(bias, ((0, 0), (0, Cp - C)))

    # ---- Batch tiling: exact single tile for small B; otherwise >=2 "parallel"
    #      tiles so both v7x TensorCores get work (harmless on v5e/v6e).
    if B <= 8:
        TB, nb = B, 1
    elif B <= 128:
        TB = min(64, _round_up(_cdiv(B, 2), 8))
        nb = _cdiv(B, TB)
    else:
        TB, nb = 64, _cdiv(B, 64)
    B_out = nb * TB                         # output blocks never go OOB

    # ---- Token tiling from the generation-aware VMEM budget, with lane-padded
    #      byte accounting and TN rounded to the dtype's sublane packing.
    usable = _vmem_usable_bytes()
    sub = max(8, 32 // itemsize)            # 8 / 16 / 32 rows for 4 / 2 / 1 byte dtypes
    fixed = (2 * (D_eff * Cp + Cp) * w_itemsize   # resident W + bias (double-buffered)
             + TB * lane_D * 4                    # f32 accumulator scratch
             + 2 * TB * Cp * out_itemsize)        # output double-buffer
    x_budget = max(4 << 20, usable - fixed - (4 << 20))
    tn_cap = max(sub, (x_budget // (2 * TB * lane_D * itemsize)) // sub * sub)
    if N_eff <= tn_cap:
        TN, nk, ragged = N_eff, 1, False    # full-extent block, no mask, no OOB
    else:
        TN = int(tn_cap)
        nk = _cdiv(N_eff, TN)
        ragged = (N_eff % TN) != 0

    kernel = _make_kernel(1.0 / float(N), N_eff, ragged)

    out = pl.pallas_call(
        kernel,
        out_shape=jax.ShapeDtypeStruct((B_out, Cp), out_dtype),
        grid_spec=pltpu.PrefetchScalarGridSpec(
            num_scalar_prefetch=0,
            grid=(nb, nk),
            in_specs=[
                pl.BlockSpec((TB, TN, D_eff), lambda i, k: (i, k, 0)),  # streamed x
                pl.BlockSpec((D_eff, Cp), lambda i, k: (0, 0)),          # resident W
                pl.BlockSpec((1, Cp), lambda i, k: (0, 0)),              # resident bias
            ],
            out_specs=pl.BlockSpec((TB, Cp), lambda i, k: (i, 0)),
            scratch_shapes=[pltpu.VMEM((TB, D_eff), jnp.float32)],
        ),
        compiler_params=pltpu.CompilerParams(
            dimension_semantics=("parallel", "arbitrary"),
            vmem_limit_bytes=int(usable),
        ),
    )(x, w_t, bias)

    return out[:B, :C]


if __name__ == "__main__":
    # Small shapes consistent with the module: in_channels = N tokens,
    # in_embed_dim = D, nr_classes = C.
    B, N, D, C = 2, 4, 32, 8

    key = jax.random.PRNGKey(0)
    kx, kw, kb = jax.random.split(key, 3)

    x = jax.random.normal(kx, (B, N, D), dtype=jnp.float32)

    # nn.Linear(in_embed_dim, nr_classes) stores weight as (C, D); we pass it
    # pre-transposed as (D, C) and bias as (1, C).
    w = jax.random.normal(kw, (C, D), dtype=jnp.float32) * (1.0 / math.sqrt(D))
    b = jax.random.normal(kb, (C,), dtype=jnp.float32) * 0.01

    w_t = jnp.transpose(w)               # (D, C)
    bias2d = b.reshape(1, C)             # (1, C)

    out = jax.block_until_ready(averaging_pooling_head(x, w_t, bias2d))

    # Pure-JAX reference.
    ref = jnp.mean(x, axis=1) @ w_t + bias2d
    assert out.shape == (B, C)
    assert jnp.allclose(out, ref, atol=1e-4, rtol=1e-4), float(jnp.max(jnp.abs(out - ref)))

    print("KERNEL_OK")
</pallas_src>

<mosaic_0001>
module attributes {stable_mosaic.version = 11 : i64} {
  func.func @kernel(%arg0: i32, %arg1: i32, %arg2: memref<2x1x128xf32, #tpu.memory_space<vmem>>, %arg3: memref<128x128xf32, #tpu.memory_space<vmem>>, %arg4: memref<1x128xf32, #tpu.memory_space<vmem>>, %arg5: memref<2x128xf32, #tpu.memory_space<vmem>>, %arg6: memref<2x128xf32, #tpu.memory_space<vmem>>) attributes {dimension_semantics = [#tpu.dimension_semantics<parallel>, #tpu.dimension_semantics<arbitrary>], iteration_bounds = array<i64: 1, 1>, scalar_prefetch = 0 : i64, scratch_operands = 1 : i64, tpu.core_type = #tpu.core_type<tc>, window_params = [{transform_indices = @transform_0, window_bounds = array<i64: 2, 1, 128>}, {pipeline_mode = #tpu.pipeline_mode<synchronous>, transform_indices = @transform_1, window_bounds = array<i64: 128, 128>}, {pipeline_mode = #tpu.pipeline_mode<synchronous>, transform_indices = @transform_2, window_bounds = array<i64: 1, 128>}, {transform_indices = @transform_3, window_bounds = array<i64: 2, 128>}]} {
    %c0_i32 = arith.constant 0 : i32
    %0 = arith.cmpi eq, %arg1, %c0_i32 : i32
    %1 = arith.extui %0 : i1 to i32
    %c0_i32_0 = arith.constant 0 : i32
    %2 = arith.cmpi ne, %1, %c0_i32_0 : i32
    scf.if %2 {
      %cst_9 = arith.constant 0.000000e+00 : f32
      %11 = vector.broadcast %cst_9 : f32 to vector<2x128xf32>
      %c0_10 = arith.constant 0 : index
      %c0_11 = arith.constant 0 : index
      %12 = vector.load %arg6[%c0_10, %c0_11] : memref<2x128xf32, #tpu.memory_space<vmem>>, vector<2x128xf32>
      tpu.vector_store %arg6[%c0_10, %c0_11], %11 {strides = array<i32>} : memref<2x128xf32, #tpu.memory_space<vmem>>, vector<2x128xf32>,
    } else {
    }
    %c0 = arith.constant 0 : index
    %c0_1 = arith.constant 0 : index
    %c0_2 = arith.constant 0 : index
    %3 = vector.load %arg2[%c0, %c0_1, %c0_2] : memref<2x1x128xf32, #tpu.memory_space<vmem>>, vector<2x1x128xf32>
    %c0_3 = arith.constant 0 : index
    %c0_4 = arith.constant 0 : index
    %4 = vector.load %arg6[%c0_3, %c0_4] : memref<2x128xf32, #tpu.memory_space<vmem>>, vector<2x128xf32>
    %cst = arith.constant dense<0.000000e+00> : vector<2x128xf32>
    %5 = vector.multi_reduction <add>, %3, %cst [1] : vector<2x1x128xf32> to vector<2x128xf32>
    %6 = arith.addf %4, %5 : vector<2x128xf32>
    %c0_5 = arith.constant 0 : index
    %c0_6 = arith.constant 0 : index
    %7 = vector.load %arg6[%c0_5, %c0_6] : memref<2x128xf32, #tpu.memory_space<vmem>>, vector<2x128xf32>
    tpu.vector_store %arg6[%c0_5, %c0_6], %6 {strides = array<i32>} : memref<2x128xf32, #tpu.memory_space<vmem>>, vector<2x128xf32>,
    %c0_i32_7 = arith.constant 0 : i32
    %8 = arith.cmpi eq, %arg1, %c0_i32_7 : i32
    %9 = arith.extui %8 : i1 to i32
    %c0_i32_8 = arith.constant 0 : i32
    %10 = arith.cmpi ne, %9, %c0_i32_8 : i32
    scf.if %10 {
      %c0_9 = arith.constant 0 : index
      %c0_10 = arith.constant 0 : index
      %11 = vector.load %arg6[%c0_9, %c0_10] : memref<2x128xf32, #tpu.memory_space<vmem>>, vector<2x128xf32>
      %cst_11 = arith.constant 2.500000e-01 : f32
      %12 = vector.broadcast %cst_11 : f32 to vector<2x128xf32>
      %13 = arith.mulf %11, %12 : vector<2x128xf32>
      %c0_12 = arith.constant 0 : index
      %c0_13 = arith.constant 0 : index
      %14 = vector.load %arg3[%c0_12, %c0_13] : memref<128x128xf32, #tpu.memory_space<vmem>>, vector<128x128xf32>
      %cst_14 = arith.constant dense<0.000000e+00> : vector<2x128xf32>
      %15 = tpu.matmul %13, %14, %cst_14 {dimension_numbers = #tpu.dot_dimension_numbers<[1], [0], [0], [1], [0, 0, 1, 1], [], []>} : vector<2x128xf32>, vector<128x128xf32>, vector<2x128xf32> -> vector<2x128xf32>
      %c0_15 = arith.constant 0 : index
      %c0_16 = arith.constant 0 : index
      %16 = vector.load %arg4[%c0_15, %c0_16] : memref<1x128xf32, #tpu.memory_space<vmem>>, vector<1x128xf32>
      %17 = vector.broadcast %16 : vector<1x128xf32> to vector<2x128xf32>
      %18 = arith.addf %15, %17 : vector<2x128xf32>
      %c0_17 = arith.constant 0 : index
      %c0_18 = arith.constant 0 : index
      %19 = vector.load %arg5[%c0_17, %c0_18] : memref<2x128xf32, #tpu.memory_space<vmem>>, vector<2x128xf32>
      tpu.vector_store %arg5[%c0_17, %c0_18], %18 {strides = array<i32>} : memref<2x128xf32, #tpu.memory_space<vmem>>, vector<2x128xf32>,
    } else {
    }
    return
  }
  func.func @transform_0(%arg0: i32, %arg1: i32) -> (i32, i32, i32) {
    %c0_i32 = arith.constant 0 : i32
    %c0_i32_0 = arith.constant 0 : i32
    return %arg0, %arg1, %c0_i32 : i32, i32, i32
  }
  func.func @transform_1(%arg0: i32, %arg1: i32) -> (i32, i32) {
    %c0_i32 = arith.constant 0 : i32
    %c0_i32_0 = arith.constant 0 : i32
    %c0_i32_1 = arith.constant 0 : i32
    return %c0_i32, %c0_i32_0 : i32, i32
  }
  func.func @transform_2(%arg0: i32, %arg1: i32) -> (i32, i32) {
    %c0_i32 = arith.constant 0 : i32
    %c0_i32_0 = arith.constant 0 : i32
    %c0_i32_1 = arith.constant 0 : i32
    return %c0_i32, %c0_i32_0 : i32, i32
  }
  func.func @transform_3(%arg0: i32, %arg1: i32) -> (i32, i32) {
    %c0_i32 = arith.constant 0 : i32
    %c0_i32_0 = arith.constant 0 : i32
    return %arg0, %c0_i32 : i32, i32
  }
}

</mosaic_0001>

<bundles_post_ra>
// kernel: averaging_pooling_head.1
= control target key start
LH: loop header
LB: loop body
LE: loop exit
PB: predicated region body
PF: predicated region fallthrough
CT: control target
= control target key end

     0   :  { %v31_v1 = vlaneseq  ;;  %v237_v2 = vmov 0.0   ;;  %vm238_vm0 = vmmov 0   ;;  %v239_v4 = vmov 1966171168   ;;  %s339_s0 = inlined_call_operand.vmem [shape: f32[2,1,128], index: 0, kind: input, shape index: {}]   ;;  %s340_s1 = inlined_call_operand.vmem [shape: f32[128,128], index: 1, kind: input, shape index: {}]   ;;  %s341_s2 = inlined_call_operand.vmem [shape: f32[1,128], index: 2, kind: input, shape index: {}]   ;;  %s342_s3 = inlined_call_operand.hbm [shape: f32[2,128], index: 3, kind: output, shape index: {}]  }
   0x1   :  { %v65_v0 = vld [vmem:[%s340_s1 + $0x78] sm:$0xff]  ;;  %176 = vmatprep.subr.mxu0 %v237_v2  ;;  %19 = vst [vmem:[#allocation2] sm:$0x3] %v237_v2  ;;  %v64_v3 = vld [vmem:[%s340_s1 + $0x70] sm:$0xff]  ;;  %208 = vmatprep.mubr.msk.f32.mxu0 %vm238_vm0, %v237_v2  ;;  %v29_v5 = vunpack.c.l.s4 %v239_v4  ;;  %v63_v7 = vld [vmem:[%s340_s1 + $0x68] sm:$0xff] }
   0x2   :  { %177 = vmatpush3.msra.mxu0 %v65_v0  ;;  %v32_v6 = vshrl.u32 %v31_v1, 7  ;;  %v62_v9 = vld [vmem:[%s340_s1 + $0x60] sm:$0xff] }
   0x3   :  { %178 = vmatprep.subr.mxu0 %v237_v2  ;;  %v30_v8 = vunpack.c.0.s8 %v29_v5  ;;  %v20_v10 = vld [vmem:[%s339_s0] sm:$0x1]  ;;  %v21_v11 = vld [vmem:[%s339_s0 + $0x1] sm:$0x1] }
   0x4   :  { %179 = vmatpush3.msra.mxu0 %v64_v3  ;;  %v27_v12 = vcombine.low %v20_v10, %v21_v11 }
   0x5   :  { %180 = vmatprep.subr.mxu0 %v237_v2  ;;  %v33_v13 = vsub.s32 %v30_v8, %v32_v6 }
   0x6   :  { %181 = vmatpush3.msra.mxu0 %v63_v7 }
   0x7   :  { %8 = vsyncpa [#allocation4], 0  ;;  %182 = vmatprep.subr.mxu0 %v237_v2  ;;  %v61_v14 = vld [vmem:[%s340_s1 + $0x58] sm:$0xff]  ;;  %v34_v15 = vrot.slane %v27_v12, %v33_v13  ;;  %v60_v16 = vld [vmem:[%s340_s1 + $0x50] sm:$0xff]  ;;  %s240_s22 = smov [#allocation3]  }
   0x8   :  { %183 = vmatpush3.msra.mxu0 %v62_v9  ;;  %v22_v17 = vld [vmem:[#allocation2] sm:$0x3]  ;;  %v59_v19 = vld [vmem:[%s340_s1 + $0x48] sm:$0xff]  ;;  %v57_v22 = vld [vmem:[%s340_s1 + $0x38] sm:$0xff]  ;;  %s150_s23 = sshll.u32 %s240_s22, 4  ;;  %s151_s23 = int_to_ptr.vmem [resolvable:$true] %s150_s23 }
   0x9   :  { %184 = vmatprep.subr.mxu0 %v237_v2  ;;  %v41_v18 = vrot.slane %v34_v15, %v33_v13  ;;  %v58_v21 = vld [vmem:[%s340_s1 + $0x40] sm:$0xff]  ;;  %v56_v23 = vld [vmem:[%s340_s1 + $0x30] sm:$0xff]  ;;  %v55_v24 = vld [vmem:[%s340_s1 + $0x28] sm:$0xff]  ;;  %s215_s24 = scalar_lea.vmem %s151_s23, 32  ;;  %p220_p1 = scmp.lt.s32.totalorder %s151_s23, %s151_s23 }
   0xa   :  { %185 = vmatpush3.msra.mxu0 %v61_v14  ;;  %v54_v25 = vld [vmem:[%s340_s1 + $0x20] sm:$0xff]  ;;  %v53_v26 = vld [vmem:[%s340_s1 + $0x18] sm:$0xff]  ;;  %v52_v27 = vld [vmem:[%s340_s1 + $0x10] sm:$0xff]  ;;  %p216_p0 = scmp.ne.s32.totalorder %s151_s23, %s215_s24  ;;  %p221_p2 = scmp.lt.s32.totalorder %s215_s24, %s215_s24 }
   0xb   :  { %186 = vmatprep.subr.mxu0 %v237_v2  ;;  %v43_v20 = vadd.f32 %v41_v18, %v22_v17  ;;  %v51_v29 = vld [vmem:[%s340_s1 + $0x8] sm:$0xff]  ;;  %v50_v30 = vld [vmem:[%s340_s1] sm:$0xff] }
   0xc   :  { %187 = vmatpush3.msra.mxu0 %v60_v16  ;;  %v158_v32 = vld [vmem:[%s341_s2] ss:$0 sm:$0xff]  ;;  %p222_p3 = por %p221_p2, %p220_p1 }
   0xd   :  { %188 = vmatprep.subr.mxu0 %v237_v2  ;;  %44 = vst [vmem:[#allocation2] sm:$0x3] %v43_v20 }
   0xe   :  { %189 = vmatpush3.msra.mxu0 %v59_v19  ;;  %p223_p4 = pnand %p222_p3, %p216_p0 }
   0xf   :  { %190 = vmatprep.subr.mxu0 %v237_v2 }
  0x10   :  { %191 = vmatpush3.msra.mxu0 %v58_v21 }
  0x11   :  { %192 = vmatprep.subr.mxu0 %v237_v2 }
  0x12   :  { %193 = vmatpush3.msra.mxu0 %v57_v22 }
  0x13   :  { %194 = vmatprep.subr.mxu0 %v237_v2 }
  0x14   :  { %195 = vmatpush3.msra.mxu0 %v56_v23  ;;  %v48_v28 = vld [vmem:[#allocation2] sm:$0x3] }
  0x15   :  { %196 = vmatprep.subr.mxu0 %v237_v2  ;;  %v49_v31 = vmul.f32 0.25, %v48_v28 }
  0x16   :  { %197 = vmatpush3.msra.mxu0 %v55_v24 }
  0x17   :  { %198 = vmatprep.subr.mxu0 %v237_v2 }
  0x18   :  { %199 = vmatpush3.msra.mxu0 %v54_v25 }
  0x19   :  { %200 = vmatprep.subr.mxu0 %v237_v2 }
  0x1a   :  { %201 = vmatpush3.msra.mxu0 %v53_v26 }
  0x1b   :  { %202 = vmatprep.subr.mxu0 %v237_v2 }
  0x1c   :  { %203 = vmatpush3.msra.mxu0 %v52_v27 }
  0x1d   :  { %204 = vmatprep.subr.mxu0 %v237_v2 }
  0x1e   :  { %205 = vmatpush3.msra.mxu0 %v51_v29 }
  0x1f   :  { %206 = vmatprep.subr.mxu0 %v237_v2 }
  0x20   :  { %207 = vmatpush3.msra.mxu0 %v50_v30 }
  0x21   :  { %209 = vmatmul.mubr.f32.vlgmr.msra.gmra.mxu0 %v49_v31 }
  0xe1   :  { %v139_v33 = vpop.f32.mrf.mxu0 }
  0xe2   :  { %v140_v34 = vadd.f32 %v158_v32, %v139_v33 }
  0xe3   :  { %v210_v35 = vpop.f32.mrf.mxu0 }
  0xe4   :  { %143 = vst [vmem:[#allocation3] sm:$0x3] %v140_v34 }
  0xe5   :  { %226 = shalt.err (!%p223_p4)
}
  0xe6   :  { %153 = dma.vmem_to_hbm [thread:$0]  %s151_s23, 32, %s342_s3, [#allocation4]  }
  0xe7   :  { %235 = dma.done.wait [#allocation4], 32  }
  0xe8   :  { %236 = vsyncadd [#allocation4], 4294967264 }
  0xe9   :  { %157 = vsyncpa [#allocation4], 1 }

</bundles_post_ra>
